<compile_context>
chip_gen: v7x
topology: tpu7x:2x2x1
jax: 0.10.0
libtpu: 0.0.40
codegen_flags: <defaults>
</compile_context>

<pallas_src>
import jax
import jax.numpy as jnp
from jax import lax
from jax.experimental import pallas as pl
from jax.experimental.pallas import tpu as pltpu


def _round_up(x, m):
    return (x + m - 1) // m * m


# -----------------------------------------------------------------------------
# Parameter prep (done ONCE, not per step): pad weights to lane-dense tiles.
# -----------------------------------------------------------------------------
def prepare_encoder_params(ih, hh):
    """Pad ih (V, H) -> (V, Hp) and hh (H, H) -> (Hp, Hp), Hp = roundup(H, 128)."""
    H = hh.shape[0]
    Hp = _round_up(H, 128)
    ih_p = jnp.pad(ih.astype(jnp.float32), ((0, 0), (0, Hp - H)))
    hh_p = jnp.pad(hh.astype(jnp.float32), ((0, Hp - H), (0, Hp - H)))
    return ih_p, hh_p


# -----------------------------------------------------------------------------
# Single-step kernel:  out = tanh(state @ hh + emb)
#   emb = ih[token] is gathered by XLA in the wrapper.  Pure VMEM-resident
#   compute in the body: one MXU matmul, one VPU add, one EUP tanh.
# -----------------------------------------------------------------------------
def _encoder_rnn_step_kernel(state_ref, hh_ref, emb_ref, out_ref):
    sh = jnp.dot(state_ref[...], hh_ref[...],
                 preferred_element_type=jnp.float32)
    out_ref[...] = jnp.tanh(sh + emb_ref[...])


def encoder_rnn_forward(state, token, ih_p, hh_p):
    """Pallas implementation of EncoderRNN.forward(state, token).

    ih_p / hh_p are the pre-padded parameters from prepare_encoder_params.
    For decoding over many steps, use encoder_rnn_encode (fused over T)
    instead of calling this in a Python loop.
    """
    B, H = state.shape
    Hp = hh_p.shape[0]
    Bp = _round_up(B, 8)

    emb = ih_p[token]                                        # (B, Hp) XLA gather
    emb_p = jnp.pad(emb, ((0, Bp - B), (0, 0)))
    state_p = jnp.pad(state.astype(jnp.float32), ((0, Bp - B), (0, Hp - H)))

    out = pl.pallas_call(
        _encoder_rnn_step_kernel,
        out_shape=jax.ShapeDtypeStruct((Bp, Hp), jnp.float32),
        grid=(1,),
        in_specs=[
            pl.BlockSpec((Bp, Hp), lambda i: (0, 0)),        # state
            pl.BlockSpec((Hp, Hp), lambda i: (0, 0)),        # hh
            pl.BlockSpec((Bp, Hp), lambda i: (0, 0)),        # gathered embeddings
        ],
        out_specs=pl.BlockSpec((Bp, Hp), lambda i: (0, 0)),
        compiler_params=pltpu.CompilerParams(
            dimension_semantics=("arbitrary",)),
    )(state_p, hh_p, emb_p)
    return out[:B, :H]


# -----------------------------------------------------------------------------
# Fused multi-timestep kernel: all T sequential RNN steps inside ONE grid step.
# Hidden state is carried as an f32 fori_loop value (one vreg); hh and the
# gathered embeddings for all T steps stay VMEM-resident.
# -----------------------------------------------------------------------------
def _encoder_rnn_seq_kernel(state0_ref, hh_ref, emb_ref, outs_ref):
    T = emb_ref.shape[0]
    hh = hh_ref[...]                       # hoisted: loaded once, reused T times

    def step(t, h):
        h_new = jnp.tanh(
            jnp.dot(h, hh, preferred_element_type=jnp.float32) + emb_ref[t])
        outs_ref[t] = h_new                # lane-dense (Bp, Hp) store
        return h_new

    lax.fori_loop(0, T, step, state0_ref[...], unroll=True)


def encoder_rnn_encode(state0, tokens, ih_p, hh_p):
    """Run T sequential EncoderRNN steps in ONE pallas_call.

    tokens: (T, B) int.  Returns all hidden states, shape (T, B, H).
    Step t semantics are identical to forward(state_t, tokens[t]).
    """
    T, B = tokens.shape
    H = state0.shape[1]
    Hp = hh_p.shape[0]
    Bp = _round_up(B, 8)

    emb = ih_p[tokens]                                       # (T, B, Hp) gather
    emb_p = jnp.pad(emb, ((0, 0), (0, Bp - B), (0, 0)))
    state_p = jnp.pad(state0.astype(jnp.float32), ((0, Bp - B), (0, Hp - H)))

    # TODO(synk): on v7x (2 TensorCores), shard real batches >= 16 over a
    # leading "parallel" grid axis (each shard with its own carried state);
    # at batch 8 (one sublane tile) this is a no-op.
    outs = pl.pallas_call(
        _encoder_rnn_seq_kernel,
        out_shape=jax.ShapeDtypeStruct((T, Bp, Hp), jnp.float32),
        grid=(1,),
        in_specs=[
            pl.BlockSpec((Bp, Hp), lambda i: (0, 0)),        # state0 (resident)
            pl.BlockSpec((Hp, Hp), lambda i: (0, 0)),        # hh     (resident)
            pl.BlockSpec((T, Bp, Hp), lambda i: (0, 0, 0)),  # embeddings, all T
        ],
        out_specs=pl.BlockSpec((T, Bp, Hp), lambda i: (0, 0, 0)),
        compiler_params=pltpu.CompilerParams(
            dimension_semantics=("arbitrary",)),
    )(state_p, hh_p, emb_p)
    return outs[:, :B, :H]


def init_state(init_state_param, batch_size):
    """EncoderRNN.init_state: broadcast the learned initial state (glue)."""
    return jnp.broadcast_to(init_state_param[None, :],
                            (batch_size, init_state_param.shape[0]))


if __name__ == "__main__":
    # Small shapes consistent with the module: vocab=16, hidden=32, batch=8.
    vocab_size, hidden_size, batch, seq_len = 16, 32, 8, 6

    key = jax.random.PRNGKey(0)
    k_init, k_ih, k_hh, k_tok, k_state, k_seq = jax.random.split(key, 6)

    # Deterministic parameter init mirroring torch.normal(0, 0.02, shape).
    init_state_param = 0.02 * jax.random.normal(k_init, (hidden_size,), jnp.float32)
    ih = 0.02 * jax.random.normal(k_ih, (vocab_size, hidden_size), jnp.float32)
    hh = 0.02 * jax.random.normal(k_hh, (hidden_size, hidden_size), jnp.float32)

    # One-time weight padding (hoisted glue).
    ih_p, hh_p = prepare_encoder_params(ih, hh)

    # Example inputs.
    token = jax.random.randint(k_tok, (batch,), 0, vocab_size, jnp.int32)
    state = init_state(init_state_param, batch)
    state = state + 0.02 * jax.random.normal(k_state, (batch, hidden_size), jnp.float32)

    forward = jax.jit(encoder_rnn_forward)   # fuses pad/gather glue with the kernel
    encode = jax.jit(encoder_rnn_encode)

    # --- single-step forward (matches EncoderRNN.forward) ---------------------
    out = forward(state, token, ih_p, hh_p)
    out = jax.block_until_ready(out)
    assert out.shape == (batch, hidden_size)

    ref = jnp.tanh(state @ hh + ih[token])
    assert jnp.allclose(out, ref, atol=1e-4, rtol=1e-3), "single-step mismatch"

    # --- fused multi-step encoder (all T steps in one kernel invocation) ------
    tokens = jax.random.randint(k_seq, (seq_len, batch), 0, vocab_size, jnp.int32)
    outs = encode(state, tokens, ih_p, hh_p)
    outs = jax.block_until_ready(outs)
    assert outs.shape == (seq_len, batch, hidden_size)

    h = state
    for t in range(seq_len):
        h = jnp.tanh(h @ hh + ih[tokens[t]])
        assert jnp.allclose(outs[t], h, atol=1e-4, rtol=1e-3), f"mismatch step {t}"

    print("KERNEL_OK")
</pallas_src>

<mosaic_0001>
module attributes {stable_mosaic.version = 11 : i64} {
  func.func @_encoder_rnn_step_kernel(%arg0: i32, %arg1: memref<8x128xf32, #tpu.memory_space<vmem>>, %arg2: memref<128x128xf32, #tpu.memory_space<vmem>>, %arg3: memref<8x128xf32, #tpu.memory_space<vmem>>, %arg4: memref<8x128xf32, #tpu.memory_space<vmem>>) attributes {dimension_semantics = [#tpu.dimension_semantics<arbitrary>], iteration_bounds = array<i64: 1>, scalar_prefetch = 0 : i64, scratch_operands = 0 : i64, tpu.core_type = #tpu.core_type<tc>, window_params = [{pipeline_mode = #tpu.pipeline_mode<synchronous>, transform_indices = @transform_0, window_bounds = array<i64: 8, 128>}, {pipeline_mode = #tpu.pipeline_mode<synchronous>, transform_indices = @transform_1, window_bounds = array<i64: 128, 128>}, {pipeline_mode = #tpu.pipeline_mode<synchronous>, transform_indices = @transform_2, window_bounds = array<i64: 8, 128>}, {pipeline_mode = #tpu.pipeline_mode<synchronous>, transform_indices = @transform_3, window_bounds = array<i64: 8, 128>}]} {
    %c0 = arith.constant 0 : index
    %c0_0 = arith.constant 0 : index
    %0 = vector.load %arg1[%c0, %c0_0] : memref<8x128xf32, #tpu.memory_space<vmem>>, vector<8x128xf32>
    %c0_1 = arith.constant 0 : index
    %c0_2 = arith.constant 0 : index
    %1 = vector.load %arg2[%c0_1, %c0_2] : memref<128x128xf32, #tpu.memory_space<vmem>>, vector<128x128xf32>
    %cst = arith.constant dense<0.000000e+00> : vector<8x128xf32>
    %2 = tpu.matmul %0, %1, %cst {dimension_numbers = #tpu.dot_dimension_numbers<[1], [0], [0], [1], [0, 0, 1, 1], [], []>} : vector<8x128xf32>, vector<128x128xf32>, vector<8x128xf32> -> vector<8x128xf32>
    %c0_3 = arith.constant 0 : index
    %c0_4 = arith.constant 0 : index
    %3 = vector.load %arg3[%c0_3, %c0_4] : memref<8x128xf32, #tpu.memory_space<vmem>>, vector<8x128xf32>
    %4 = arith.addf %2, %3 : vector<8x128xf32>
    %5 = math.tanh %4 : vector<8x128xf32>
    %c0_5 = arith.constant 0 : index
    %c0_6 = arith.constant 0 : index
    %6 = vector.load %arg4[%c0_5, %c0_6] : memref<8x128xf32, #tpu.memory_space<vmem>>, vector<8x128xf32>
    tpu.vector_store %arg4[%c0_5, %c0_6], %5 {strides = array<i32>} : memref<8x128xf32, #tpu.memory_space<vmem>>, vector<8x128xf32>,
    return
  }
  func.func @transform_0(%arg0: i32) -> (i32, i32) {
    %c0_i32 = arith.constant 0 : i32
    %c0_i32_0 = arith.constant 0 : i32
    %c0_i32_1 = arith.constant 0 : i32
    return %c0_i32, %c0_i32_0 : i32, i32
  }
  func.func @transform_1(%arg0: i32) -> (i32, i32) {
    %c0_i32 = arith.constant 0 : i32
    %c0_i32_0 = arith.constant 0 : i32
    %c0_i32_1 = arith.constant 0 : i32
    return %c0_i32, %c0_i32_0 : i32, i32
  }
  func.func @transform_2(%arg0: i32) -> (i32, i32) {
    %c0_i32 = arith.constant 0 : i32
    %c0_i32_0 = arith.constant 0 : i32
    %c0_i32_1 = arith.constant 0 : i32
    return %c0_i32, %c0_i32_0 : i32, i32
  }
  func.func @transform_3(%arg0: i32) -> (i32, i32) {
    %c0_i32 = arith.constant 0 : i32
    %c0_i32_0 = arith.constant 0 : i32
    %c0_i32_1 = arith.constant 0 : i32
    return %c0_i32, %c0_i32_0 : i32, i32
  }
}

</mosaic_0001>

<bundles_post_ra>
// kernel: encoder_rnn_forward.1
= control target key start
LH: loop header
LB: loop body
LE: loop exit
PB: predicated region body
PF: predicated region fallthrough
CT: control target
= control target key end

     0   :  { %8 = vsyncpa [#allocation3], 0  ;;  %s324_s0 = inlined_call_operand.vmem [shape: f32[8,128], index: 0, kind: input, shape index: {}]   ;;  %s325_s1 = inlined_call_operand.hbm [shape: f32[128,128], index: 1, kind: input, shape index: {}]   ;;  %s326_s2 = inlined_call_operand.vmem [shape: f32[8,128], index: 2, kind: input, shape index: {}]   ;;  %s327_s3 = inlined_call_operand.hbm [shape: f32[8,128], index: 3, kind: output, shape index: {}]  }
   0x1   :  { %9 = vsyncpa [#allocation4], 0  ;;  %s267_s12 = smov [#allocation2]   ;;  %s219_s16 = scalar_lea.hbm %s325_s1, 2048 }
   0x2   :  { %s17_s13 = sshll.u32 %s267_s12, 4  ;;  %p220_p0 = scmp.ne.s32.totalorder %s325_s1, %s219_s16  ;;  %s18_s13 = int_to_ptr.vmem [resolvable:$true] %s17_s13 }
   0x3   :  { %p223_p1 = scmp.lt.u32.totalorder %s219_s16, %s325_s1 }
   0x5   :  { %p225_p2 = pnand %p223_p1, %p220_p0 }
   0x7   :  { %228 = shalt.err (!%p225_p2)
}
   0x8   :  { %s229_s21 = scalar_lea.vmem %s18_s13, 2048  ;;  %p234_p4 = scmp.lt.s32.totalorder %s18_s13, %s18_s13 }
   0x9   :  { %p230_p3 = scmp.ne.s32.totalorder %s18_s13, %s229_s21  ;;  %p235_p5 = scmp.lt.s32.totalorder %s229_s21, %s229_s21 }
   0xb   :  { %p236_p6 = por %p235_p5, %p234_p4 }
   0xd   :  { %p237_p7 = pnand %p236_p6, %p230_p3 }
   0xf   :  { %240 = shalt.err (!%p237_p7)
}
  0x10   :  { %s268_s22 = smov 128   ;;  %s269_s23 = smov 8  }
  0x11   :  { %23 = dma.hbm_to_vmem [thread:$0]  %s325_s1, 2048, %s18_s13, [#allocation3], %s268_s22, %s268_s22, %s269_s23  }
  0x12   :  { %263 = dma.done.wait [#allocation3], 2048  }
  0x13   :  { %264 = vsyncadd [#allocation3], 4294965248  ;;  %v270_v0 = vmov 0.0|0.0   ;;  %vm271_vm0 = vmmov 0   ;;  %v272_v1 = vmov 0.0   ;;  %v30_v2 = vld [vmem:[#allocation2] sm:$0xff] }
  0x14   :  { %186 = vmatprep.subr.bf16.mxu0 %v270_v0  ;;  %183 = vmatprep.mubr.msk.f32.mxu0 %vm271_vm0, %v272_v1  ;;  %v31_v3 = vld [vmem:[#allocation2 + $0x8] sm:$0xff]  ;;  %v32_v4 = vld [vmem:[#allocation2 + $0x10] sm:$0xff]  ;;  %v33_v6 = vld [vmem:[#allocation2 + $0x18] sm:$0xff]  ;;  %s273_s29 = smov [#allocation5]  }
  0x15   :  { %v187_v5 = vpack.c.bf16 %v31_v3, %v30_v2  ;;  %v190_v7 = vpack.c.bf16 %v33_v6, %v32_v4  ;;  %v34_v8 = vld [vmem:[#allocation2 + $0x20] sm:$0xff]  ;;  %v35_v9 = vld [vmem:[#allocation2 + $0x28] sm:$0xff]  ;;  %v36_v11 = vld [vmem:[#allocation2 + $0x30] sm:$0xff]  ;;  %s125_s30 = sshll.u32 %s273_s29, 4  ;;  %s126_s30 = int_to_ptr.vmem [resolvable:$true] %s125_s30 }
  0x16   :  { %v193_v10 = vpack.c.bf16 %v35_v9, %v34_v8  ;;  %v37_v12 = vld [vmem:[#allocation2 + $0x38] sm:$0xff]  ;;  %v38_v14 = vld [vmem:[#allocation2 + $0x40] sm:$0xff]  ;;  %v39_v15 = vld [vmem:[#allocation2 + $0x48] sm:$0xff]  ;;  %s241_s4 = scalar_lea.vmem %s126_s30, 128  ;;  %p246_p9 = scmp.lt.s32.totalorder %s126_s30, %s126_s30 }
  0x17   :  { %188 = vmatpush3.bf16.msra.mxu0 %v187_v5  ;;  %v196_v13 = vpack.c.bf16 %v37_v12, %v36_v11  ;;  %v199_v16 = vpack.c.bf16 %v39_v15, %v38_v14  ;;  %v40_v17 = vld [vmem:[#allocation2 + $0x50] sm:$0xff]  ;;  %v41_v18 = vld [vmem:[#allocation2 + $0x58] sm:$0xff]  ;;  %v42_v20 = vld [vmem:[#allocation2 + $0x60] sm:$0xff]  ;;  %p242_p8 = scmp.ne.s32.totalorder %s126_s30, %s241_s4  ;;  %p247_p10 = scmp.lt.s32.totalorder %s241_s4, %s241_s4 }
  0x18   :  { %189 = vmatprep.subr.bf16.mxu0 %v270_v0  ;;  %v202_v19 = vpack.c.bf16 %v41_v18, %v40_v17  ;;  %v43_v21 = vld [vmem:[#allocation2 + $0x68] sm:$0xff]  ;;  %v44_v23 = vld [vmem:[#allocation2 + $0x70] sm:$0xff]  ;;  %v45_v24 = vld [vmem:[#allocation2 + $0x78] sm:$0xff] }
  0x19   :  { %v205_v22 = vpack.c.bf16 %v43_v21, %v42_v20  ;;  %v208_v25 = vpack.c.bf16 %v45_v24, %v44_v23  ;;  %v29_v26 = vld [vmem:[%s324_s0] sm:$0xff]  ;;  %p248_p11 = por %p247_p10, %p246_p9 }
  0x1a   :  { %v46_v27 = vld [vmem:[%s326_s2] sm:$0xff] }
  0x1b   :  { %191 = vmatpush3.bf16.msra.mxu0 %v190_v7  ;;  %p249_p12 = pnand %p248_p11, %p242_p8 }
  0x1c   :  { %192 = vmatprep.subr.bf16.mxu0 %v270_v0 }
  0x1f   :  { %194 = vmatpush3.bf16.msra.mxu0 %v193_v10 }
  0x20   :  { %195 = vmatprep.subr.bf16.mxu0 %v270_v0 }
  0x23   :  { %197 = vmatpush3.bf16.msra.mxu0 %v196_v13 }
  0x24   :  { %198 = vmatprep.subr.bf16.mxu0 %v270_v0 }
  0x27   :  { %200 = vmatpush3.bf16.msra.mxu0 %v199_v16 }
  0x28   :  { %201 = vmatprep.subr.bf16.mxu0 %v270_v0 }
  0x2b   :  { %203 = vmatpush3.bf16.msra.mxu0 %v202_v19 }
  0x2c   :  { %204 = vmatprep.subr.bf16.mxu0 %v270_v0 }
  0x2f   :  { %206 = vmatpush3.bf16.msra.mxu0 %v205_v22 }
  0x30   :  { %207 = vmatprep.subr.bf16.mxu0 %v270_v0 }
  0x33   :  { %209 = vmatpush3.bf16.msra.mxu0 %v208_v25 }
  0x36   :  { %184 = vmatmul.mubr.f32.vlgmr.msra.gmra.mrb[0].mxu0 %v29_v26 }
 0x109   :  { %v113_v28 = vpop.f32.mrb[0].mxu0 }
 0x10a   :  { %v114_v29 = vadd.f32 %v113_v28, %v46_v27  ;;  %v185_v30 = vpop.f32.mrb[1].mxu0 }
 0x10c   :  { %217 = vtanh.f32 %v114_v29 }
 0x116   :  { %v218_v31 = vpop.eup %217 }
 0x117   :  { %118 = vst [vmem:[#allocation5] sm:$0xff] %v218_v31 }
 0x118   :  { %252 = shalt.err (!%p249_p12)
}
 0x119   :  { %s253_s2 = scalar_lea.hbm %s327_s3, 128 }
 0x11a   :  { %p254_p13 = scmp.ne.s32.totalorder %s327_s3, %s253_s2  ;;  %p257_p0 = scmp.lt.u32.totalorder %s253_s2, %s327_s3 }
 0x11c   :  { %p259_p1 = pnand %p257_p0, %p254_p13 }
 0x11e   :  { %262 = shalt.err (!%p259_p1)
}
 0x11f   :  { %128 = dma.vmem_to_hbm [thread:$0]  %s126_s30, 128, %s327_s3, [#allocation4]  }
 0x120   :  { %265 = dma.done.wait [#allocation4], 128  }
 0x121   :  { %266 = vsyncadd [#allocation4], 4294967168 }
 0x122   :  { %132 = vsyncpa [#allocation3], 1 }
 0x123   :  { %133 = vsyncpa [#allocation4], 1 }

</bundles_post_ra>
